<compile_context>
chip_gen: v7x
topology: tpu7x:2x2x1
jax: 0.10.0
libtpu: 0.0.40
codegen_flags: <defaults>
</compile_context>

<pallas_src>
import numpy as np
import jax
import jax.numpy as jnp
from jax.experimental import pallas as pl
from jax.experimental.pallas import tpu as pltpu


HIDDEN = 400  # note: pads to 512 lanes in VMEM (~78% MXU lane util); do NOT
              # zero-pad the weight in HBM — that adds bytes to a mem-bound DMA.


def metric_mlp_kernel(x_ref, w1_ref, b1_ref, w2_ref, b2_ref, h2_ref):
    # h1 = ReLU(x @ W1 + b1)                        (TB, 400)
    # W1 lives in HBM as bf16 (half the bytes); widen in-VMEM to f32.
    # TODO(synk): for very large D (>= ~8-12K on v7x's 64 MiB VMEM) tile the
    # x@W1 contraction over K with an f32 accumulator scratch + pl.when(k==0)
    # init instead of keeping W1 fully resident.
    w1 = w1_ref[...].astype(jnp.float32)
    h1 = jnp.maximum(
        jnp.dot(x_ref[...], w1, preferred_element_type=jnp.float32) + b1_ref[...],
        0.0,
    )
    # Fused heads: W2 = [Wd | Wl]  ->  h2 = h1 @ W2 + b2   (TB, ld + k)
    w2 = w2_ref[...].astype(jnp.float32)
    h2_ref[...] = (
        jnp.dot(h1, w2, preferred_element_type=jnp.float32) + b2_ref[...]
    )


def make_params(input_dim, latent_dim, hidden=HIDDEN, seed=0):
    """Deterministic synthetic parameters (shapes match nn.Linear in the module)."""
    D = int(np.prod(input_dim))
    k = latent_dim * (latent_dim - 1) // 2
    key = jax.random.PRNGKey(seed)
    ks = jax.random.split(key, 6)

    def lin(kw, kb, fan_in, fan_out):
        bound = 1.0 / np.sqrt(fan_in)
        w = jax.random.uniform(kw, (fan_in, fan_out), jnp.float32, -bound, bound)
        b = jax.random.uniform(kb, (1, fan_out), jnp.float32, -bound, bound)
        return w, b

    w1, b1 = lin(ks[0], ks[1], D, hidden)            # layers[0]: Linear(D, 400)
    wd, bd = lin(ks[2], ks[3], hidden, latent_dim)   # diag:  Linear(400, ld)
    wl, bl = lin(ks[4], ks[5], hidden, k)            # lower: Linear(400, k)

    # Fuse the two heads column-wise: first ld columns = diag, last k = lower.
    w2 = jnp.concatenate([wd, wl], axis=1)           # (400, ld + k)
    b2 = jnp.concatenate([bd, bl], axis=1)           # (1,   ld + k)

    return dict(
        w1_bf16=w1.astype(jnp.bfloat16),   # bf16 in HBM: halves dominant DMA
        w2_bf16=w2.astype(jnp.bfloat16),
        b1=b1,                             # biases / activations stay f32
        b2=b2,
    )


def metric_mlp_forward(x, params, latent_dim):
    B = x.shape[0]
    D = int(np.prod(x.shape[1:]))
    ld = latent_dim
    k = ld * (ld - 1) // 2
    H2 = ld + k

    x2 = x.reshape(B, D).astype(jnp.float32)

    # Batch tiling: pad B up to a multiple of 8 (f32 sublane), tile at <=128.
    TB = min(128, max(8, ((B + 7) // 8) * 8))
    Bp = ((B + TB - 1) // TB) * TB
    if Bp != B:
        x2 = jnp.pad(x2, ((0, Bp - B), (0, 0)))

    grid = (Bp // TB,)

    h2 = pl.pallas_call(
        metric_mlp_kernel,
        out_shape=jax.ShapeDtypeStruct((Bp, H2), jnp.float32),
        grid_spec=pltpu.PrefetchScalarGridSpec(
            num_scalar_prefetch=0,
            grid=grid,
            in_specs=[
                pl.BlockSpec((TB, D), lambda i: (i, 0)),        # x tile (pipelined)
                pl.BlockSpec((D, HIDDEN), lambda i: (0, 0)),    # W1, resident
                pl.BlockSpec((1, HIDDEN), lambda i: (0, 0)),    # b1, resident
                pl.BlockSpec((HIDDEN, H2), lambda i: (0, 0)),   # W2 (fused heads)
                pl.BlockSpec((1, H2), lambda i: (0, 0)),        # b2
            ],
            out_specs=pl.BlockSpec((TB, H2), lambda i: (i, 0)),
        ),
        compiler_params=pltpu.CompilerParams(
            # batch axis is embarrassingly parallel -> lets v7x use both TCs
            dimension_semantics=("parallel",),
            # explicit budget: comfortably inside v7x's 64 MiB physical VMEM
            vmem_limit_bytes=32 * 1024 * 1024,
        ),
    )(x2, params["w1_bf16"], params["b1"], params["w2_bf16"], params["b2"])

    h2 = h2[:B]                 # drop batch padding
    h21 = h2[:, :ld]            # diag head
    h22 = h2[:, ld:]            # strictly-lower head

    # Scatter into the lower-triangular factor in plain JAX (O(B*ld^2) data;
    # no dense one-hot matmul, scales with latent_dim).
    rows, cols = np.tril_indices(ld, k=-1)
    L = jnp.zeros((B, ld, ld), jnp.float32)
    L = L.at[:, rows, cols].set(h22)
    L = L + jnp.exp(h21)[:, :, None] * jnp.eye(ld, dtype=jnp.float32)[None]
    return L


def metric_mlp_reference(x, params, latent_dim):
    """Pure-JAX reference mirroring the PyTorch forward (same bf16-rounded weights)."""
    B = x.shape[0]
    D = int(np.prod(x.shape[1:]))
    x2 = x.reshape(B, D).astype(jnp.float32)
    w1 = params["w1_bf16"].astype(jnp.float32)
    w2 = params["w2_bf16"].astype(jnp.float32)
    h1 = jnp.maximum(x2 @ w1 + params["b1"], 0.0)
    h2 = h1 @ w2 + params["b2"]
    ld = latent_dim
    h21 = h2[:, :ld]
    h22 = h2[:, ld:]
    rows, cols = np.tril_indices(ld, k=-1)
    L = jnp.zeros((B, ld, ld), jnp.float32)
    L = L.at[:, rows, cols].set(h22)
    L = L + jax.vmap(jnp.diag)(jnp.exp(h21))
    return L


if __name__ == "__main__":
    # Shapes consistent with the module: args.input_dim = (4, 16, 16),
    # args.latent_dim = 8  ->  D = 1024, hidden = 400, k = 28.
    input_dim = (4, 16, 16)
    latent_dim = 8
    B = 2

    key = jax.random.PRNGKey(0)
    x = jax.random.normal(key, (B,) + input_dim, dtype=jnp.float32)

    params = make_params(input_dim, latent_dim, seed=0)

    L = metric_mlp_forward(x, params, latent_dim)
    L = jax.block_until_ready(L)

    L_ref = metric_mlp_reference(x, params, latent_dim)
    assert L.shape == (B, latent_dim, latent_dim)
    assert jnp.allclose(L, L_ref, atol=1e-4, rtol=1e-4), "mismatch vs reference"

    print("KERNEL_OK")
</pallas_src>

<mosaic_0001>
module attributes {stable_mosaic.version = 11 : i64} {
  func.func @metric_mlp_kernel(%arg0: i32, %arg1: memref<8x1024xf32, #tpu.memory_space<vmem>>, %arg2: memref<1024x400xbf16, #tpu.memory_space<vmem>>, %arg3: memref<1x400xf32, #tpu.memory_space<vmem>>, %arg4: memref<400x36xbf16, #tpu.memory_space<vmem>>, %arg5: memref<1x36xf32, #tpu.memory_space<vmem>>, %arg6: memref<8x36xf32, #tpu.memory_space<vmem>>) attributes {dimension_semantics = [#tpu.dimension_semantics<parallel>], iteration_bounds = array<i64: 1>, scalar_prefetch = 0 : i64, scratch_operands = 0 : i64, tpu.core_type = #tpu.core_type<tc>, window_params = [{transform_indices = @transform_0, window_bounds = array<i64: 8, 1024>}, {pipeline_mode = #tpu.pipeline_mode<synchronous>, transform_indices = @transform_1, window_bounds = array<i64: 1024, 400>}, {pipeline_mode = #tpu.pipeline_mode<synchronous>, transform_indices = @transform_2, window_bounds = array<i64: 1, 400>}, {pipeline_mode = #tpu.pipeline_mode<synchronous>, transform_indices = @transform_3, window_bounds = array<i64: 400, 36>}, {pipeline_mode = #tpu.pipeline_mode<synchronous>, transform_indices = @transform_4, window_bounds = array<i64: 1, 36>}, {transform_indices = @transform_5, window_bounds = array<i64: 8, 36>}]} {
    %c0 = arith.constant 0 : index
    %c0_0 = arith.constant 0 : index
    %0 = vector.load %arg2[%c0, %c0_0] : memref<1024x400xbf16, #tpu.memory_space<vmem>>, vector<1024x400xbf16>
    %1 = arith.extf %0 : vector<1024x400xbf16> to vector<1024x400xf32>
    %c0_1 = arith.constant 0 : index
    %c0_2 = arith.constant 0 : index
    %2 = vector.load %arg1[%c0_1, %c0_2] : memref<8x1024xf32, #tpu.memory_space<vmem>>, vector<8x1024xf32>
    %cst = arith.constant dense<0.000000e+00> : vector<8x400xf32>
    %3 = tpu.matmul %2, %1, %cst {dimension_numbers = #tpu.dot_dimension_numbers<[1], [0], [0], [1], [0, 0, 1, 1], [], []>} : vector<8x1024xf32>, vector<1024x400xf32>, vector<8x400xf32> -> vector<8x400xf32>
    %c0_3 = arith.constant 0 : index
    %c0_4 = arith.constant 0 : index
    %4 = vector.load %arg3[%c0_3, %c0_4] : memref<1x400xf32, #tpu.memory_space<vmem>>, vector<1x400xf32>
    %5 = vector.broadcast %4 : vector<1x400xf32> to vector<8x400xf32>
    %6 = arith.addf %3, %5 : vector<8x400xf32>
    %cst_5 = arith.constant 0.000000e+00 : f32
    %7 = vector.broadcast %cst_5 : f32 to vector<8x400xf32>
    %8 = arith.maximumf %6, %7 : vector<8x400xf32>
    %c0_6 = arith.constant 0 : index
    %c0_7 = arith.constant 0 : index
    %9 = vector.load %arg4[%c0_6, %c0_7] : memref<400x36xbf16, #tpu.memory_space<vmem>>, vector<400x36xbf16>
    %10 = arith.extf %9 : vector<400x36xbf16> to vector<400x36xf32>
    %cst_8 = arith.constant dense<0.000000e+00> : vector<8x36xf32>
    %11 = tpu.matmul %8, %10, %cst_8 {dimension_numbers = #tpu.dot_dimension_numbers<[1], [0], [0], [1], [0, 0, 1, 1], [], []>} : vector<8x400xf32>, vector<400x36xf32>, vector<8x36xf32> -> vector<8x36xf32>
    %c0_9 = arith.constant 0 : index
    %c0_10 = arith.constant 0 : index
    %12 = vector.load %arg5[%c0_9, %c0_10] : memref<1x36xf32, #tpu.memory_space<vmem>>, vector<1x36xf32>
    %13 = vector.broadcast %12 : vector<1x36xf32> to vector<8x36xf32>
    %14 = arith.addf %11, %13 : vector<8x36xf32>
    %c0_11 = arith.constant 0 : index
    %c0_12 = arith.constant 0 : index
    %15 = vector.load %arg6[%c0_11, %c0_12] : memref<8x36xf32, #tpu.memory_space<vmem>>, vector<8x36xf32>
    tpu.vector_store %arg6[%c0_11, %c0_12], %14 {strides = array<i32>} : memref<8x36xf32, #tpu.memory_space<vmem>>, vector<8x36xf32>,
    return
  }
  func.func @transform_0(%arg0: i32) -> (i32, i32) {
    %c0_i32 = arith.constant 0 : i32
    %c0_i32_0 = arith.constant 0 : i32
    return %arg0, %c0_i32 : i32, i32
  }
  func.func @transform_1(%arg0: i32) -> (i32, i32) {
    %c0_i32 = arith.constant 0 : i32
    %c0_i32_0 = arith.constant 0 : i32
    %c0_i32_1 = arith.constant 0 : i32
    return %c0_i32, %c0_i32_0 : i32, i32
  }
  func.func @transform_2(%arg0: i32) -> (i32, i32) {
    %c0_i32 = arith.constant 0 : i32
    %c0_i32_0 = arith.constant 0 : i32
    %c0_i32_1 = arith.constant 0 : i32
    return %c0_i32, %c0_i32_0 : i32, i32
  }
  func.func @transform_3(%arg0: i32) -> (i32, i32) {
    %c0_i32 = arith.constant 0 : i32
    %c0_i32_0 = arith.constant 0 : i32
    %c0_i32_1 = arith.constant 0 : i32
    return %c0_i32, %c0_i32_0 : i32, i32
  }
  func.func @transform_4(%arg0: i32) -> (i32, i32) {
    %c0_i32 = arith.constant 0 : i32
    %c0_i32_0 = arith.constant 0 : i32
    %c0_i32_1 = arith.constant 0 : i32
    return %c0_i32, %c0_i32_0 : i32, i32
  }
  func.func @transform_5(%arg0: i32) -> (i32, i32) {
    %c0_i32 = arith.constant 0 : i32
    %c0_i32_0 = arith.constant 0 : i32
    return %arg0, %c0_i32 : i32, i32
  }
}

</mosaic_0001>

<bundles_post_ra>
// kernel: tpu_custom_call.1
= control target key start
LH: loop header
LB: loop body
LE: loop exit
PB: predicated region body
PF: predicated region fallthrough
CT: control target
= control target key end

     0   :  { %s3989_s0 = inlined_call_operand.vmem [shape: f32[8,1024], index: 0, kind: input, shape index: {}]   ;;  %s3990_s1 = inlined_call_operand.vmem [shape: bf16[1024,400], index: 1, kind: input, shape index: {}]   ;;  %s3991_s2 = inlined_call_operand.vmem [shape: f32[1,400], index: 2, kind: input, shape index: {}]   ;;  %s3992_s3 = inlined_call_operand.vmem [shape: bf16[400,36], index: 3, kind: input, shape index: {}]   ;;  %s3993_s4 = inlined_call_operand.vmem [shape: f32[1,36], index: 4, kind: input, shape index: {}]   ;;  %s3994_s5 = inlined_call_operand.hbm [shape: f32[8,36], index: 5, kind: output, shape index: {}]  }
   0x1   :  { %v2664_v0 = vld [vmem:[%s3990_s1 + $0x4] ss:$16 sps:$4 sm:$0xff]   ;;  %v2666_v1 = vld [vmem:[%s3990_s1 + $0xc] ss:$16 sps:$4 sm:$0xff]   ;;  %v2668_v2 = vld [vmem:[%s3990_s1] ss:$16 sps:$4 sm:$0xff]  }
   0x2   :  { %1820 = vmatprep.subr.bf16.mxu0 %v2664_v0  ;;  %v2669_v3 = vld [vmem:[%s3990_s1 + $0x8] ss:$16 sps:$4 sm:$0xff]   ;;  %2076 = vmatprep.subr.bf16.mxu1 %v2666_v1  ;;  %v2670_v4 = vld [vmem:[%s3990_s1 + $0x24] ss:$16 sps:$4 sm:$0xff]   ;;  %v2672_v5 = vld [vmem:[%s3990_s1 + $0x2c] ss:$16 sps:$4 sm:$0xff]  }
   0x3   :  { %1822 = vmatpush1.bf16.msra.mxu0 %v2668_v2  ;;  %2078 = vmatpush1.bf16.msra.mxu1 %v2669_v3  ;;  %v2674_v6 = vld [vmem:[%s3990_s1 + $0x20] ss:$16 sps:$4 sm:$0xff]   ;;  %v2675_v7 = vld [vmem:[%s3990_s1 + $0x28] ss:$16 sps:$4 sm:$0xff]   ;;  %v2676_v8 = vld [vmem:[%s3990_s1 + $0x44] ss:$16 sps:$4 sm:$0xff]  }
   0x4   :  { %1824 = vmatprep.subr.bf16.mxu0 %v2670_v4  ;;  %2080 = vmatprep.subr.bf16.mxu1 %v2672_v5  ;;  %v2678_v9 = vld [vmem:[%s3990_s1 + $0x4c] ss:$16 sps:$4 sm:$0xff]   ;;  %v2680_v10 = vld [vmem:[%s3990_s1 + $0x40] ss:$16 sps:$4 sm:$0xff]   ;;  %v2681_v11 = vld [vmem:[%s3990_s1 + $0x48] ss:$16 sps:$4 sm:$0xff]  }
   0x5   :  { %v2682_v12 = vld [vmem:[%s3990_s1 + $0x64] ss:$16 sps:$4 sm:$0xff]   ;;  %v2684_v13 = vld [vmem:[%s3990_s1 + $0x6c] ss:$16 sps:$4 sm:$0xff]   ;;  %v2686_v14 = vld [vmem:[%s3990_s1 + $0x60] ss:$16 sps:$4 sm:$0xff]  }
   0x6   :  { %v2687_v15 = vld [vmem:[%s3990_s1 + $0x68] ss:$16 sps:$4 sm:$0xff]   ;;  %v2688_v16 = vld [vmem:[%s3990_s1 + $0x84] ss:$16 sps:$4 sm:$0xff]   ;;  %v2690_v17 = vld [vmem:[%s3990_s1 + $0x8c] ss:$16 sps:$4 sm:$0xff]  }
   0x7   :  { %1826 = vmatpush1.bf16.msra.mxu0 %v2674_v6  ;;  %2082 = vmatpush1.bf16.msra.mxu1 %v2675_v7  ;;  %v2692_v18 = vld [vmem:[%s3990_s1 + $0x80] ss:$16 sps:$4 sm:$0xff]   ;;  %v2693_v19 = vld [vmem:[%s3990_s1 + $0x88] ss:$16 sps:$4 sm:$0xff]   ;;  %v2694_v20 = vld [vmem:[%s3990_s1 + $0xa4] ss:$16 sps:$4 sm:$0xff]  }
   0x8   :  { %1828 = vmatprep.subr.bf16.mxu0 %v2676_v8  ;;  %2084 = vmatprep.subr.bf16.mxu1 %v2678_v9  ;;  %v2696_v21 = vld [vmem:[%s3990_s1 + $0xac] ss:$16 sps:$4 sm:$0xff]   ;;  %v2698_v22 = vld [vmem:[%s3990_s1 + $0xa0] ss:$16 sps:$4 sm:$0xff]   ;;  %v2699_v23 = vld [vmem:[%s3990_s1 + $0xa8] ss:$16 sps:$4 sm:$0xff]  }
   0x9   :  { %v2700_v24 = vld [vmem:[%s3990_s1 + $0xc4] ss:$16 sps:$4 sm:$0xff]   ;;  %v2702_v25 = vld [vmem:[%s3990_s1 + $0xcc] ss:$16 sps:$4 sm:$0xff]   ;;  %v2704_v26 = vld [vmem:[%s3990_s1 + $0xc0] ss:$16 sps:$4 sm:$0xff]  }
   0xa   :  { %v2705_v27 = vld [vmem:[%s3990_s1 + $0xc8] ss:$16 sps:$4 sm:$0xff]   ;;  %v2706_v28 = vld [vmem:[%s3990_s1 + $0xe4] ss:$16 sps:$4 sm:$0xff]   ;;  %v2708_v29 = vld [vmem:[%s3990_s1 + $0xec] ss:$16 sps:$4 sm:$0xff]  }
   0xb   :  { %1830 = vmatpush1.bf16.msra.mxu0 %v2680_v10  ;;  %2086 = vmatpush1.bf16.msra.mxu1 %v2681_v11  ;;  %v2710_v30 = vld [vmem:[%s3990_s1 + $0xe0] ss:$16 sps:$4 sm:$0xff]   ;;  %v2711_v31 = vld [vmem:[%s3990_s1 + $0xe8] ss:$16 sps:$4 sm:$0xff]   ;;  %v2712_v32 = vld [vmem:[%s3990_s1 + $0x104] ss:$16 sps:$4 sm:$0xff]  }
   0xc   :  { %1832 = vmatprep.subr.bf16.mxu0 %v2682_v12  ;;  %2088 = vmatprep.subr.bf16.mxu1 %v2684_v13  ;;  %v2714_v33 = vld [vmem:[%s3990_s1 + $0x10c] ss:$16 sps:$4 sm:$0xff]   ;;  %v2716_v34 = vld [vmem:[%s3990_s1 + $0x100] ss:$16 sps:$4 sm:$0xff]   ;;  %v2717_v35 = vld [vmem:[%s3990_s1 + $0x108] ss:$16 sps:$4 sm:$0xff]  }
   0xd   :  { %v2718_v36 = vld [vmem:[%s3990_s1 + $0x124] ss:$16 sps:$4 sm:$0xff]   ;;  %v2720_v37 = vld [vmem:[%s3990_s1 + $0x12c] ss:$16 sps:$4 sm:$0xff]   ;;  %v2722_v38 = vld [vmem:[%s3990_s1 + $0x120] ss:$16 sps:$4 sm:$0xff]  }
   0xe   :  { %v2723_v39 = vld [vmem:[%s3990_s1 + $0x128] ss:$16 sps:$4 sm:$0xff]   ;;  %v2724_v40 = vld [vmem:[%s3990_s1 + $0x144] ss:$16 sps:$4 sm:$0xff]   ;;  %v2726_v41 = vld [vmem:[%s3990_s1 + $0x14c] ss:$16 sps:$4 sm:$0xff]  }
   0xf   :  { %1834 = vmatpush1.bf16.msra.mxu0 %v2686_v14  ;;  %2090 = vmatpush1.bf16.msra.mxu1 %v2687_v15  ;;  %v2728_v42 = vld [vmem:[%s3990_s1 + $0x140] ss:$16 sps:$4 sm:$0xff]   ;;  %v2729_v43 = vld [vmem:[%s3990_s1 + $0x148] ss:$16 sps:$4 sm:$0xff]   ;;  %v2730_v44 = vld [vmem:[%s3990_s1 + $0x164] ss:$16 sps:$4 sm:$0xff]  }
  0x10   :  { %1836 = vmatprep.subr.bf16.mxu0 %v2688_v16  ;;  %2092 = vmatprep.subr.bf16.mxu1 %v2690_v17  ;;  %v2732_v45 = vld [vmem:[%s3990_s1 + $0x16c] ss:$16 sps:$4 sm:$0xff]   ;;  %v2734_v47 = vld [vmem:[%s3990_s1 + $0x160] ss:$16 sps:$4 sm:$0xff]   ;;  %v2735_v48 = vld [vmem:[%s3990_s1 + $0x168] ss:$16 sps:$4 sm:$0xff]  }
  0x11   :  { %v790_v46 = vld [vmem:[%s3989_s0 + $0x8] sm:$0xff]  ;;  %v2736_v49 = vld [vmem:[%s3990_s1 + $0x184] ss:$16 sps:$4 sm:$0xff]   ;;  %v2740_v51 = vld [vmem:[%s3990_s1 + $0x180] ss:$16 sps:$4 sm:$0xff]  }
  0x12   :  { %883 = vmatprep.mubr.f32.mxu0 %v790_v46  ;;  %1167 = vmatprep.mubr.f32.mxu1 %v790_v46  ;;  %v2738_v50 = vld [vmem:[%s3990_s1 + $0x18c] ss:$16 sps:$4 sm:$0xff]   ;;  %v2741_v52 = vld [vmem:[%s3990_s1 + $0x188] ss:$16 sps:$4 sm:$0xff]   ;;  %v2742_v53 = vld [vmem:[%s3990_s1 + $0x1a4] ss:$16 sps:$4 sm:$0xff]  }
  0x13   :  { %1838 = vmatpush1.bf16.msra.mxu0 %v2692_v18  ;;  %2094 = vmatpush1.bf16.msra.mxu1 %v2693_v19  ;;  %v2744_v54 = vld [vmem:[%s3990_s1 + $0x1ac] ss:$16 sps:$4 sm:$0xff]   ;;  %v2746_v55 = vld [vmem:[%s3990_s1 + $0x1a0] ss:$16 sps:$4 sm:$0xff]   ;;  %v2747_v56 = vld [vmem:[%s3990_s1 + $0x1a8] ss:$16 sps:$4 sm:$0xff]  }
  0x14   :  { %1840 = vmatprep.subr.bf16.mxu0 %v2694_v20  ;;  %2096 = vmatprep.subr.bf16.mxu1 %v2696_v21  ;;  %v2748_v57 = vld [vmem:[%s3990_s1 + $0x1c4] ss:$16 sps:$4 sm:$0xff]   ;;  %v2750_v58 = vld [vmem:[%s3990_s1 + $0x1cc] ss:$16 sps:$4 sm:$0xff]   ;;  %v2752_v59 = vld [vmem:[%s3990_s1 + $0x1c0] ss:$16 sps:$4 sm:$0xff]  }
  0x15   :  { %v2753_v60 = vld [vmem:[%s3990_s1 + $0x1c8] ss:$16 sps:$4 sm:$0xff]   ;;  %v2754_v61 = vld [vmem:[%s3990_s1 + $0x1e4] ss:$16 sps:$4 sm:$0xff]   ;;  %v2756_v62 = vld [vmem:[%s3990_s1 + $0x1ec] ss:$16 sps:$4 sm:$0xff]  }
  0x16   :  { %v2758_v63 = vld [vmem:[%s3990_s1 + $0x1e0] ss:$16 sps:$4 sm:$0xff]   ;;  %v2759_v0 = vld [vmem:[%s3990_s1 + $0x1e8] ss:$16 sps:$4 sm:$0xff]   ;;  %v2760_v1 = vld [vmem:[%s3990_s1 + $0x204] ss:$16 sps:$4 sm:$0xff]  }
  0x17   :  { %1842 = vmatpush1.bf16.msra.mxu0 %v2698_v22  ;;  %2098 = vmatpush1.bf16.msra.mxu1 %v2699_v23  ;;  %v2763_v2 = vld [vmem:[%s3990_s1 + $0x20c] ss:$16 sps:$4 sm:$0xff]   ;;  %v2762_v3 = vld [vmem:[%s3990_s1 + $0x200] ss:$16 sps:$4 sm:$0xff]   ;;  %v2765_v4 = vld [vmem:[%s3990_s1 + $0x208] ss:$16 sps:$4 sm:$0xff]  }
  0x18   :  { %1844 = vmatprep.subr.bf16.mxu0 %v2700_v24  ;;  %2100 = vmatprep.subr.bf16.mxu1 %v2702_v25  ;;  %v789_v5 = vld [vmem:[%s3989_s0] sm:$0xff]  ;;  %v2769_v7 = vld [vmem:[%s3990_s1 + $0x22c] ss:$16 sps:$4 sm:$0xff]   ;;  %v2771_v9 = vld [vmem:[%s3990_s1 + $0x228] ss:$16 sps:$4 sm:$0xff]  }
  0x19   :  { %v2766_v6 = vld [vmem:[%s3990_s1 + $0x224] ss:$16 sps:$4 sm:$0xff]   ;;  %v2768_v8 = vld [vmem:[%s3990_s1 + $0x220] ss:$16 sps:$4 sm:$0xff]   ;;  %v2775_v11 = vld [vmem:[%s3990_s1 + $0x24c] ss:$16 sps:$4 sm:$0xff]  }
  0x1a   :  { %v2772_v10 = vld [vmem:[%s3990_s1 + $0x244] ss:$16 sps:$4 sm:$0xff]   ;;  %v2774_v12 = vld [vmem:[%s3990_s1 + $0x240] ss:$16 sps:$4 sm:$0xff]   ;;  %v2777_v13 = vld [vmem:[%s3990_s1 + $0x248] ss:$16 sps:$4 sm:$0xff]  }
  0x1b   :  { %1846 = vmatpush1.bf16.msra.mxu0 %v2704_v26  ;;  %2102 = vmatpush1.bf16.msra.mxu1 %v2705_v27  ;;  %v2778_v14 = vld [vmem:[%s3990_s1 + $0x264] ss:$16 sps:$4 sm:$0xff]   ;;  %v2781_v15 = vld [vmem:[%s3990_s1 + $0x26c] ss:$16 sps:$4 sm:$0xff]   ;;  %v2780_v16 = vld [vmem:[%s3990_s1 + $0x260] ss:$16 sps:$4 sm:$0xff]  }
  0x1c   :  { %1848 = vmatprep.subr.bf16.mxu0 %v2706_v28  ;;  %2104 = vmatprep.subr.bf16.mxu1 %v2708_v29  ;;  %v2783_v17 = vld [vmem:[%s3990_s1 + $0x268] ss:$16 sps:$4 sm:$0xff]   ;;  %v2784_v18 = vld [vmem:[%s3990_s1 + $0x284] ss:$16 sps:$4 sm:$0xff]   ;;  %v2787_v19 = vld [vmem:[%s3990_s1 + $0x28c] ss:$16 sps:$4 sm:$0xff]  }
  0x1d   :  { %v2786_v20 = vld [vmem:[%s3990_s1 + $0x280] ss:$16 sps:$4 sm:$0xff]   ;;  %v2789_v21 = vld [vmem:[%s3990_s1 + $0x288] ss:$16 sps:$4 sm:$0xff]   ;;  %v2790_v22 = vld [vmem:[%s3990_s1 + $0x2a4] ss:$16 sps:$4 sm:$0xff]  }
  0x1e   :  { %v2793_v23 = vld [vmem:[%s3990_s1 + $0x2ac] ss:$16 sps:$4 sm:$0xff]   ;;  %v2792_v24 = vld [vmem:[%s3990_s1 + $0x2a0] ss:$16 sps:$4 sm:$0xff]   ;;  %v2795_v25 = vld [vmem:[%s3990_s1 + $0x2a8] ss:$16 sps:$4 sm:$0xff]  }
  0x1f   :  { %1850 = vmatpush1.bf16.msra.mxu0 %v2710_v30  ;;  %2106 = vmatpush1.bf16.msra.mxu1 %v2711_v31  ;;  %v2796_v26 = vld [vmem:[%s3990_s1 + $0x2c4] ss:$16 sps:$4 sm:$0xff]   ;;  %v2799_v27 = vld [vmem:[%s3990_s1 + $0x2cc] ss:$16 sps:$4 sm:$0xff]   ;;  %v2798_v29 = vld [vmem:[%s3990_s1 + $0x2c0] ss:$16 sps:$4 sm:$0xff]  }
  0x20   :  { %1852 = vmatprep.subr.bf16.mxu0 %v2712_v32  ;;  %2108 = vmatprep.subr.bf16.mxu1 %v2714_v33  ;;  %v792_v28 = vld [vmem:[%s3989_s0 + $0x18] sm:$0xff]  ;;  %v2802_v31 = vld [vmem:[%s3990_s1 + $0x2e4] ss:$16 sps:$4 sm:$0xff]   ;;  %v2804_v33 = vld [vmem:[%s3990_s1 + $0x2e0] ss:$16 sps:$4 sm:$0xff]  }
  0x21   :  { %v2801_v30 = vld [vmem:[%s3990_s1 + $0x2c8] ss:$16 sps:$4 sm:$0xff]   ;;  %v2805_v32 = vld [vmem:[%s3990_s1 + $0x2ec] ss:$16 sps:$4 sm:$0xff]  }
  0x22   :  { %v2825_v46 = vld [vmem:[%s3990_s1 + $0x348] ss:$16 sps:$4 sm:$0xff]  }
  0x23   :  { %1854 = vmatpush1.bf16.msra.mxu0 %v2716_v34  ;;  %2110 = vmatpush1.bf16.msra.mxu1 %v2717_v35  ;;  %v2807_v34 = vld [vmem:[%s3990_s1 + $0x2e8] ss:$16 sps:$4 sm:$0xff]   ;;  %v2808_v35 = vld [vmem:[%s3990_s1 + $0x304] ss:$16 sps:$4 sm:$0xff]  }
  0x24   :  { %1856 = vmatprep.subr.bf16.mxu0 %v2718_v36  ;;  %2112 = vmatprep.subr.bf16.mxu1 %v2720_v37  ;;  %v2811_v36 = vld [vmem:[%s3990_s1 + $0x30c] ss:$16 sps:$4 sm:$0xff]   ;;  %v2810_v37 = vld [vmem:[%s3990_s1 + $0x300] ss:$16 sps:$4 sm:$0xff]  }
  0x27   :  { %1858 = vmatpush1.bf16.msra.mxu0 %v2722_v38  ;;  %2114 = vmatpush1.bf16.msra.mxu1 %v2723_v39  ;;  %v2813_v38 = vld [vmem:[%s3990_s1 + $0x308] ss:$16 sps:$4 sm:$0xff]   ;;  %v2814_v39 = vld [vmem:[%s3990_s1 + $0x324] ss:$16 sps:$4 sm:$0xff]  }
  0x28   :  { %1860 = vmatprep.subr.bf16.mxu0 %v2724_v40  ;;  %2116 = vmatprep.subr.bf16.mxu1 %v2726_v41  ;;  %v2817_v40 = vld [vmem:[%s3990_s1 + $0x32c] ss:$16 sps:$4 sm:$0xff]   ;;  %v2816_v41 = vld [vmem:[%s3990_s1 + $0x320] ss:$16 sps:$4 sm:$0xff]  }
  0x2b   :  { %1862 = vmatpush1.bf16.msra.mxu0 %v2728_v42  ;;  %2118 = vmatpush1.bf16.msra.mxu1 %v2729_v43  ;;  %v2819_v42 = vld [vmem:[%s3990_s1 + $0x328] ss:$16 sps:$4 sm:$0xff]   ;;  %v2820_v43 = vld [vmem:[%s3990_s1 + $0x344] ss:$16 sps:$4 sm:$0xff]  }
  0x2c   :  { %1864 = vmatprep.subr.bf16.mxu0 %v2730_v44  ;;  %2120 = vmatprep.subr.bf16.mxu1 %v2732_v45  ;;  %v2823_v44 = vld [vmem:[%s3990_s1 + $0x34c] ss:$16 sps:$4 sm:$0xff]   ;;  %v2822_v45 = vld [vmem:[%s3990_s1 + $0x340] ss:$16 sps:$4 sm:$0xff]  }
  0x2f   :  { %1866 = vmatpush1.bf16.msra.mxu0 %v2734_v47  ;;  %2122 = vmatpush1.bf16.msra.mxu1 %v2735_v48  ;;  %v2826_v47 = vld [vmem:[%s3990_s1 + $0x364] ss:$16 sps:$4 sm:$0xff]   ;;  %v2829_v48 = vld [vmem:[%s3990_s1 + $0x36c] ss:$16 sps:$4 sm:$0xff]  }
  0x30   :  { %1868 = vmatprep.subr.bf16.mxu0 %v2736_v49  ;;  %2124 = vmatprep.subr.bf16.mxu1 %v2738_v50  ;;  %v2828_v49 = vld [vmem:[%s3990_s1 + $0x360] ss:$16 sps:$4 sm:$0xff]   ;;  %v2831_v50 = vld [vmem:[%s3990_s1 + $0x368] ss:$16 sps:$4 sm:$0xff]  }
  0x33   :  { %1870 = vmatpush1.bf16.msra.mxu0 %v2740_v51  ;;  %2126 = vmatpush1.bf16.msra.mxu1 %v2741_v52  ;;  %v2832_v51 = vld [vmem:[%s3990_s1 + $0x384] ss:$16 sps:$4 sm:$0xff]   ;;  %v2835_v52 = vld [vmem:[%s3990_s1 + $0x38c] ss:$16 sps:$4 sm:$0xff]  }
  0x34   :  { %1872 = vmatprep.subr.bf16.mxu0 %v2742_v53  ;;  %2128 = vmatprep.subr.bf16.mxu1 %v2744_v54  ;;  %v2834_v53 = vld [vmem:[%s3990_s1 + $0x380] ss:$16 sps:$4 sm:$0xff]   ;;  %v2837_v54 = vld [vmem:[%s3990_s1 + $0x388] ss:$16 sps:$4 sm:$0xff]  }
  0x37   :  { %1874 = vmatpush1.bf16.msra.mxu0 %v2746_v55  ;;  %2130 = vmatpush1.bf16.msra.mxu1 %v2747_v56  ;;  %v2838_v55 = vld [vmem:[%s3990_s1 + $0x3a4] ss:$16 sps:$4 sm:$0xff]   ;;  %v2841_v56 = vld [vmem:[%s3990_s1 + $0x3ac] ss:$16 sps:$4 sm:$0xff]  }
  0x38   :  { %1876 = vmatprep.subr.bf16.mxu0 %v2748_v57  ;;  %2132 = vmatprep.subr.bf16.mxu1 %v2750_v58  ;;  %v2840_v57 = vld [vmem:[%s3990_s1 + $0x3a0] ss:$16 sps:$4 sm:$0xff]   ;;  %v2843_v58 = vld [vmem:[%s3990_s1 + $0x3a8] ss:$16 sps:$4 sm:$0xff]  }
  0x3b   :  { %1878 = vmatpush1.bf16.msra.mxu0 %v2752_v59  ;;  %2134 = vmatpush1.bf16.msra.mxu1 %v2753_v60  ;;  %v2844_v59 = vld [vmem:[%s3990_s1 + $0x3c4] ss:$16 sps:$4 sm:$0xff]   ;;  %v2847_v60 = vld [vmem:[%s3990_s1 + $0x3cc] ss:$16 sps:$4 sm:$0xff]  }
  0x3c   :  { %1880 = vmatprep.subr.bf16.mxu0 %v2754_v61  ;;  %2136 = vmatprep.subr.bf16.mxu1 %v2756_v62  ;;  %v2846_v61 = vld [vmem:[%s3990_s1 + $0x3c0] ss:$16 sps:$4 sm:$0xff]   ;;  %v2849_v62 = vld [vmem:[%s3990_s1 + $0x3c8] ss:$16 sps:$4 sm:$0xff]  }
  0x3f   :  { %1882 = vmatpush1.bf16.msra.mxu0 %v2758_v63  ;;  %2138 = vmatpush1.bf16.msra.mxu1 %v2759_v0  ;;  %v2850_v63 = vld [vmem:[%s3990_s1 + $0x3e4] ss:$16 sps:$4 sm:$0xff]   ;;  %v2853_v0 = vld [vmem:[%s3990_s1 + $0x3ec] ss:$16 sps:$4 sm:$0xff]  }
  0x40   :  { %1884 = vmatprep.subr.bf16.mxu0 %v2760_v1  ;;  %2140 = vmatprep.subr.bf16.mxu1 %v2763_v2  ;;  %v2852_v1 = vld [vmem:[%s3990_s1 + $0x3e0] ss:$16 sps:$4 sm:$0xff]   ;;  %v2855_v2 = vld [vmem:[%s3990_s1 + $0x3e8] ss:$16 sps:$4 sm:$0xff]  }
  0x42   :  { %884 = vmatmul.mubr.f32.vlgmr.msra.gmra.mrb[0].mxu0 %v789_v5  ;;  %1168 = vmatmul.mubr.f32.vlgmr.msra.gmra.mrb[0].mxu1 %v789_v5  ;;  %v2858_v5 = vld [vmem:[%s3990_s1 + $0x400] ss:$16 sps:$4 sm:$0xff]  }
  0x43   :  { %1886 = vmatpush1.bf16.msra.mxu0 %v2762_v3  ;;  %2142 = vmatpush1.bf16.msra.mxu1 %v2765_v4  ;;  %v2856_v3 = vld [vmem:[%s3990_s1 + $0x404] ss:$16 sps:$4 sm:$0xff]   ;;  %v2859_v4 = vld [vmem:[%s3990_s1 + $0x40c] ss:$16 sps:$4 sm:$0xff]  }
  0x44   :  { %1888 = vmatprep.subr.bf16.mxu0 %v2766_v6  ;;  %2144 = vmatprep.subr.bf16.mxu1 %v2769_v7  ;;  %v2861_v6 = vld [vmem:[%s3990_s1 + $0x408] ss:$16 sps:$4 sm:$0xff]   ;;  %v791_v7 = vld [vmem:[%s3989_s0 + $0x10] sm:$0xff] }
  0x45   :  { %954 = vmatprep.mubr.f32.mxu0 %v792_v28  ;;  %1238 = vmatprep.mubr.f32.mxu1 %v792_v28  ;;  %v2891_v28 = vld [vmem:[%s3990_s1 + $0x4a8] ss:$16 sps:$4 sm:$0xff]  }
  0x47   :  { %1890 = vmatpush1.bf16.msra.mxu0 %v2768_v8  ;;  %2146 = vmatpush1.bf16.msra.mxu1 %v2771_v9  ;;  %v2862_v8 = vld [vmem:[%s3990_s1 + $0x424] ss:$16 sps:$4 sm:$0xff]   ;;  %v2865_v9 = vld [vmem:[%s3990_s1 + $0x42c] ss:$16 sps:$4 sm:$0xff]  }
  0x48   :  { %1892 = vmatprep.subr.bf16.mxu0 %v2772_v10  ;;  %2148 = vmatprep.subr.bf16.mxu1 %v2775_v11  ;;  %v794_v10 = vld [vmem:[%s3989_s0 + $0x28] sm:$0xff]  ;;  %v2864_v11 = vld [vmem:[%s3990_s1 + $0x420] ss:$16 sps:$4 sm:$0xff]  }
  0x4b   :  { %1894 = vmatpush1.bf16.msra.mxu0 %v2774_v12  ;;  %2150 = vmatpush1.bf16.msra.mxu1 %v2777_v13  ;;  %v2867_v12 = vld [vmem:[%s3990_s1 + $0x428] ss:$16 sps:$4 sm:$0xff]   ;;  %v2868_v13 = vld [vmem:[%s3990_s1 + $0x444] ss:$16 sps:$4 sm:$0xff]  }
  0x4c   :  { %1896 = vmatprep.subr.bf16.mxu0 %v2778_v14  ;;  %2152 = vmatprep.subr.bf16.mxu1 %v2781_v15  ;;  %v2871_v14 = vld [vmem:[%s3990_s1 + $0x44c] ss:$16 sps:$4 sm:$0xff]   ;;  %v2870_v15 = vld [vmem:[%s3990_s1 + $0x440] ss:$16 sps:$4 sm:$0xff]  }
  0x4f   :  { %1898 = vmatpush1.bf16.msra.mxu0 %v2780_v16  ;;  %2154 = vmatpush1.bf16.msra.mxu1 %v2783_v17  ;;  %v2873_v16 = vld [vmem:[%s3990_s1 + $0x448] ss:$16 sps:$4 sm:$0xff]   ;;  %v2874_v17 = vld [vmem:[%s3990_s1 + $0x464] ss:$16 sps:$4 sm:$0xff]  }
  0x50   :  { %1900 = vmatprep.subr.bf16.mxu0 %v2784_v18  ;;  %2156 = vmatprep.subr.bf16.mxu1 %v2787_v19  ;;  %v2877_v18 = vld [vmem:[%s3990_s1 + $0x46c] ss:$16 sps:$4 sm:$0xff]   ;;  %v2876_v19 = vld [vmem:[%s3990_s1 + $0x460] ss:$16 sps:$4 sm:$0xff]  }
  0x53   :  { %1902 = vmatpush1.bf16.msra.mxu0 %v2786_v20  ;;  %2158 = vmatpush1.bf16.msra.mxu1 %v2789_v21  ;;  %v2879_v20 = vld [vmem:[%s3990_s1 + $0x468] ss:$16 sps:$4 sm:$0xff]   ;;  %v2880_v21 = vld [vmem:[%s3990_s1 + $0x484] ss:$16 sps:$4 sm:$0xff]  }
  0x54   :  { %1904 = vmatprep.subr.bf16.mxu0 %v2790_v22  ;;  %2160 = vmatprep.subr.bf16.mxu1 %v2793_v23  ;;  %v2883_v22 = vld [vmem:[%s3990_s1 + $0x48c] ss:$16 sps:$4 sm:$0xff]   ;;  %v2882_v23 = vld [vmem:[%s3990_s1 + $0x480] ss:$16 sps:$4 sm:$0xff]  }
  0x57   :  { %1906 = vmatpush1.bf16.msra.mxu0 %v2792_v24  ;;  %2162 = vmatpush1.bf16.msra.mxu1 %v2795_v25  ;;  %v2885_v24 = vld [vmem:[%s3990_s1 + $0x488] ss:$16 sps:$4 sm:$0xff]   ;;  %v2886_v25 = vld [vmem:[%s3990_s1 + $0x4a4] ss:$16 sps:$4 sm:$0xff]  }
  0x58   :  { %1908 = vmatprep.subr.bf16.mxu0 %v2796_v26  ;;  %2164 = vmatprep.subr.bf16.mxu1 %v2799_v27  ;;  %v2889_v26 = vld [vmem:[%s3990_s1 + $0x4ac] ss:$16 sps:$4 sm:$0xff]   ;;  %v2888_v27 = vld [vmem:[%s3990_s1 + $0x4a0] ss:$16 sps:$4 sm:$0xff]  }
  0x5b   :  { %1910 = vmatpush1.bf16.msra.mxu0 %v2798_v29  ;;  %2166 = vmatpush1.bf16.msra.mxu1 %v2801_v30  ;;  %v2892_v29 = vld [vmem:[%s3990_s1 + $0x4c4] ss:$16 sps:$4 sm:$0xff]   ;;  %v2895_v30 = vld [vmem:[%s3990_s1 + $0x4cc] ss:$16 sps:$4 sm:$0xff]  }
  0x5c   :  { %1912 = vmatprep.subr.bf16.mxu0 %v2802_v31  ;;  %2168 = vmatprep.subr.bf16.mxu1 %v2805_v32  ;;  %v2894_v31 = vld [vmem:[%s3990_s1 + $0x4c0] ss:$16 sps:$4 sm:$0xff]   ;;  %v2897_v32 = vld [vmem:[%s3990_s1 + $0x4c8] ss:$16 sps:$4 sm:$0xff]  }
  0x5f   :  { %1914 = vmatpush1.bf16.msra.mxu0 %v2804_v33  ;;  %2170 = vmatpush1.bf16.msra.mxu1 %v2807_v34  ;;  %v2898_v33 = vld [vmem:[%s3990_s1 + $0x4e4] ss:$16 sps:$4 sm:$0xff]   ;;  %v2901_v34 = vld [vmem:[%s3990_s1 + $0x4ec] ss:$16 sps:$4 sm:$0xff]  }
  0x60   :  { %1916 = vmatprep.subr.bf16.mxu0 %v2808_v35  ;;  %2172 = vmatprep.subr.bf16.mxu1 %v2811_v36  ;;  %v2900_v35 = vld [vmem:[%s3990_s1 + $0x4e0] ss:$16 sps:$4 sm:$0xff]   ;;  %v2903_v36 = vld [vmem:[%s3990_s1 + $0x4e8] ss:$16 sps:$4 sm:$0xff]  }
  0x63   :  { %1918 = vmatpush1.bf16.msra.mxu0 %v2810_v37  ;;  %2174 = vmatpush1.bf16.msra.mxu1 %v2813_v38  ;;  %v2904_v37 = vld [vmem:[%s3990_s1 + $0x504] ss:$16 sps:$4 sm:$0xff]   ;;  %v2907_v38 = vld [vmem:[%s3990_s1 + $0x50c] ss:$16 sps:$4 sm:$0xff]  }
  0x64   :  { %1920 = vmatprep.subr.bf16.mxu0 %v2814_v39  ;;  %2176 = vmatprep.subr.bf16.mxu1 %v2817_v40  ;;  %v2906_v39 = vld [vmem:[%s3990_s1 + $0x500] ss:$16 sps:$4 sm:$0xff]   ;;  %v2909_v40 = vld [vmem:[%s3990_s1 + $0x508] ss:$16 sps:$4 sm:$0xff]  }
  0x67   :  { %1922 = vmatpush1.bf16.msra.mxu0 %v2816_v41  ;;  %2178 = vmatpush1.bf16.msra.mxu1 %v2819_v42  ;;  %v2910_v41 = vld [vmem:[%s3990_s1 + $0x524] ss:$16 sps:$4 sm:$0xff]   ;;  %v2913_v42 = vld [vmem:[%s3990_s1 + $0x52c] ss:$16 sps:$4 sm:$0xff]  }
  0x68   :  { %1924 = vmatprep.subr.bf16.mxu0 %v2820_v43  ;;  %2180 = vmatprep.subr.bf16.mxu1 %v2823_v44  ;;  %v2912_v43 = vld [vmem:[%s3990_s1 + $0x520] ss:$16 sps:$4 sm:$0xff]   ;;  %v2915_v44 = vld [vmem:[%s3990_s1 + $0x528] ss:$16 sps:$4 sm:$0xff]  }
  0x6b   :  { %1926 = vmatpush1.bf16.msra.mxu0 %v2822_v45  ;;  %2182 = vmatpush1.bf16.msra.mxu1 %v2825_v46  ;;  %v2916_v45 = vld [vmem:[%s3990_s1 + $0x544] ss:$16 sps:$4 sm:$0xff]   ;;  %v2919_v46 = vld [vmem:[%s3990_s1 + $0x54c] ss:$16 sps:$4 sm:$0xff]  }
  0x6c   :  { %1928 = vmatprep.subr.bf16.mxu0 %v2826_v47  ;;  %2184 = vmatprep.subr.bf16.mxu1 %v2829_v48  ;;  %v2918_v47 = vld [vmem:[%s3990_s1 + $0x540] ss:$16 sps:$4 sm:$0xff]   ;;  %v2921_v48 = vld [vmem:[%s3990_s1 + $0x548] ss:$16 sps:$4 sm:$0xff]  }
  0x6f   :  { %1930 = vmatpush1.bf16.msra.mxu0 %v2828_v49  ;;  %2186 = vmatpush1.bf16.msra.mxu1 %v2831_v50  ;;  %v2922_v49 = vld [vmem:[%s3990_s1 + $0x564] ss:$16 sps:$4 sm:$0xff]   ;;  %v2925_v50 = vld [vmem:[%s3990_s1 + $0x56c] ss:$16 sps:$4 sm:$0xff]  }
  0x70   :  { %1932 = vmatprep.subr.bf16.mxu0 %v2832_v51  ;;  %2188 = vmatprep.subr.bf16.mxu1 %v2835_v52  ;;  %v2924_v51 = vld [vmem:[%s3990_s1 + $0x560] ss:$16 sps:$4 sm:$0xff]   ;;  %v2927_v52 = vld [vmem:[%s3990_s1 + $0x568] ss:$16 sps:$4 sm:$0xff]  }
  0x73   :  { %1934 = vmatpush1.bf16.msra.mxu0 %v2834_v53  ;;  %2190 = vmatpush1.bf16.msra.mxu1 %v2837_v54  ;;  %v2928_v53 = vld [vmem:[%s3990_s1 + $0x584] ss:$16 sps:$4 sm:$0xff]   ;;  %v2931_v54 = vld [vmem:[%s3990_s1 + $0x58c] ss:$16 sps:$4 sm:$0xff]  }
  0x74   :  { %1936 = vmatprep.subr.bf16.mxu0 %v2838_v55  ;;  %2192 = vmatprep.subr.bf16.mxu1 %v2841_v56  ;;  %v2930_v55 = vld [vmem:[%s3990_s1 + $0x580] ss:$16 sps:$4 sm:$0xff]   ;;  %v2933_v56 = vld [vmem:[%s3990_s1 + $0x588] ss:$16 sps:$4 sm:$0xff]  }
  0x77   :  { %1938 = vmatpush1.bf16.msra.mxu0 %v2840_v57  ;;  %2194 = vmatpush1.bf16.msra.mxu1 %v2843_v58  ;;  %v2934_v57 = vld [vmem:[%s3990_s1 + $0x5a4] ss:$16 sps:$4 sm:$0xff]   ;;  %v2937_v58 = vld [vmem:[%s3990_s1 + $0x5ac] ss:$16 sps:$4 sm:$0xff]  }
  0x78   :  { %1940 = vmatprep.subr.bf16.mxu0 %v2844_v59  ;;  %2196 = vmatprep.subr.bf16.mxu1 %v2847_v60  ;;  %v2936_v59 = vld [vmem:[%s3990_s1 + $0x5a0] ss:$16 sps:$4 sm:$0xff]   ;;  %v2939_v60 = vld [vmem:[%s3990_s1 + $0x5a8] ss:$16 sps:$4 sm:$0xff]  }
  0x7b   :  { %1942 = vmatpush1.bf16.msra.mxu0 %v2846_v61  ;;  %2198 = vmatpush1.bf16.msra.mxu1 %v2849_v62 }
  0x7c   :  { %1944 = vmatprep.subr.bf16.mxu0 %v2850_v63  ;;  %2200 = vmatprep.subr.bf16.mxu1 %v2853_v0 }
  0x7f   :  { %1946 = vmatpush1.bf16.msra.mxu0 %v2852_v1  ;;  %2202 = vmatpush1.bf16.msra.mxu1 %v2855_v2 }
  0x80   :  { %1948 = vmatprep.subr.bf16.mxu0 %v2856_v3  ;;  %2204 = vmatprep.subr.bf16.mxu1 %v2859_v4 }
  0x82   :  { %955 = vmatmul.mubr.f32.vlgmr.msra.gmra.mrb[0].mxu0 %v791_v7  ;;  %1239 = vmatmul.mubr.f32.vlgmr.msra.gmra.mrb[0].mxu1 %v791_v7 }
  0x83   :  { %1950 = vmatpush1.bf16.msra.mxu0 %v2858_v5  ;;  %2206 = vmatpush1.bf16.msra.mxu1 %v2861_v6 }
  0x84   :  { %1952 = vmatprep.subr.bf16.mxu0 %v2862_v8  ;;  %2208 = vmatprep.subr.bf16.mxu1 %v2865_v9 }
  0x85   :  { %1025 = vmatprep.mubr.f32.mxu0 %v794_v10  ;;  %1309 = vmatprep.mubr.f32.mxu1 %v794_v10 }
  0x87   :  { %1954 = vmatpush1.bf16.msra.mxu0 %v2864_v11  ;;  %2210 = vmatpush1.bf16.msra.mxu1 %v2867_v12 }
  0x88   :  { %1956 = vmatprep.subr.bf16.mxu0 %v2868_v13  ;;  %2212 = vmatprep.subr.bf16.mxu1 %v2871_v14 }
  0x8b   :  { %1958 = vmatpush1.bf16.msra.mxu0 %v2870_v15  ;;  %2214 = vmatpush1.bf16.msra.mxu1 %v2873_v16 }
  0x8c   :  { %1960 = vmatprep.subr.bf16.mxu0 %v2874_v17  ;;  %2216 = vmatprep.subr.bf16.mxu1 %v2877_v18 }
  0x8f   :  { %1962 = vmatpush1.bf16.msra.mxu0 %v2876_v19  ;;  %2218 = vmatpush1.bf16.msra.mxu1 %v2879_v20 }
  0x90   :  { %1964 = vmatprep.subr.bf16.mxu0 %v2880_v21  ;;  %2220 = vmatprep.subr.bf16.mxu1 %v2883_v22 }
  0x93   :  { %1966 = vmatpush1.bf16.msra.mxu0 %v2882_v23  ;;  %2222 = vmatpush1.bf16.msra.mxu1 %v2885_v24 }
  0x94   :  { %1968 = vmatprep.subr.bf16.mxu0 %v2886_v25  ;;  %2224 = vmatprep.subr.bf16.mxu1 %v2889_v26 }
  0x97   :  { %1970 = vmatpush1.bf16.msra.mxu0 %v2888_v27  ;;  %2226 = vmatpush1.bf16.msra.mxu1 %v2891_v28 }
  0x98   :  { %1972 = vmatprep.subr.bf16.mxu0 %v2892_v29  ;;  %2228 = vmatprep.subr.bf16.mxu1 %v2895_v30 }
  0x9b   :  { %1974 = vmatpush1.bf16.msra.mxu0 %v2894_v31  ;;  %2230 = vmatpush1.bf16.msra.mxu1 %v2897_v32 }
  0x9c   :  { %1976 = vmatprep.subr.bf16.mxu0 %v2898_v33  ;;  %2232 = vmatprep.subr.bf16.mxu1 %v2901_v34 }
  0x9f   :  { %1978 = vmatpush1.bf16.msra.mxu0 %v2900_v35  ;;  %2234 = vmatpush1.bf16.msra.mxu1 %v2903_v36 }
  0xa0   :  { %1980 = vmatprep.subr.bf16.mxu0 %v2904_v37  ;;  %2236 = vmatprep.subr.bf16.mxu1 %v2907_v38 }
  0xa3   :  { %1982 = vmatpush1.bf16.msra.mxu0 %v2906_v39  ;;  %2238 = vmatpush1.bf16.msra.mxu1 %v2909_v40 }
  0xa4   :  { %1984 = vmatprep.subr.bf16.mxu0 %v2910_v41  ;;  %2240 = vmatprep.subr.bf16.mxu1 %v2913_v42 }
  0xa7   :  { %1986 = vmatpush1.bf16.msra.mxu0 %v2912_v43  ;;  %2242 = vmatpush1.bf16.msra.mxu1 %v2915_v44 }
  0xa8   :  { %1988 = vmatprep.subr.bf16.mxu0 %v2916_v45  ;;  %2244 = vmatprep.subr.bf16.mxu1 %v2919_v46 }
  0xab   :  { %1990 = vmatpush1.bf16.msra.mxu0 %v2918_v47  ;;  %2246 = vmatpush1.bf16.msra.mxu1 %v2921_v48 }
  0xac   :  { %1992 = vmatprep.subr.bf16.mxu0 %v2922_v49  ;;  %2248 = vmatprep.subr.bf16.mxu1 %v2925_v50 }
  0xaf   :  { %1994 = vmatpush1.bf16.msra.mxu0 %v2924_v51  ;;  %2250 = vmatpush1.bf16.msra.mxu1 %v2927_v52 }
  0xb0   :  { %1996 = vmatprep.subr.bf16.mxu0 %v2928_v53  ;;  %2252 = vmatprep.subr.bf16.mxu1 %v2931_v54 }
  0xb3   :  { %1998 = vmatpush1.bf16.msra.mxu0 %v2930_v55  ;;  %2254 = vmatpush1.bf16.msra.mxu1 %v2933_v56 }
  0xb4   :  { %10 = vsyncpa [#allocation3], 0  ;;  %2000 = vmatprep.subr.bf16.mxu0 %v2934_v57  ;;  %2256 = vmatprep.subr.bf16.mxu1 %v2937_v58  ;;  %v2940_v61 = vld [vmem:[%s3990_s1 + $0x5c4] ss:$16 sps:$4 sm:$0xff]   ;;  %v2943_v62 = vld [vmem:[%s3990_s1 + $0x5cc] ss:$16 sps:$4 sm:$0xff]  }
  0xb5   :  { %v2942_v63 = vld [vmem:[%s3990_s1 + $0x5c0] ss:$16 sps:$4 sm:$0xff]   ;;  %v2945_v0 = vld [vmem:[%s3990_s1 + $0x5c8] ss:$16 sps:$4 sm:$0xff]   ;;  %v2946_v1 = vld [vmem:[%s3990_s1 + $0x5e4] ss:$16 sps:$4 sm:$0xff]  }
  0xb6   :  { %v2949_v2 = vld [vmem:[%s3990_s1 + $0x5ec] ss:$16 sps:$4 sm:$0xff]   ;;  %v2948_v3 = vld [vmem:[%s3990_s1 + $0x5e0] ss:$16 sps:$4 sm:$0xff]   ;;  %v2951_v4 = vld [vmem:[%s3990_s1 + $0x5e8] ss:$16 sps:$4 sm:$0xff]  }
  0xb7   :  { %2002 = vmatpush1.bf16.msra.mxu0 %v2936_v59  ;;  %2258 = vmatpush1.bf16.msra.mxu1 %v2939_v60  ;;  %v2952_v5 = vld [vmem:[%s3990_s1 + $0x604] ss:$16 sps:$4 sm:$0xff]   ;;  %v2955_v6 = vld [vmem:[%s3990_s1 + $0x60c] ss:$16 sps:$4 sm:$0xff]   ;;  %v2954_v7 = vld [vmem:[%s3990_s1 + $0x600] ss:$16 sps:$4 sm:$0xff]  }
  0xb8   :  { %2004 = vmatprep.subr.bf16.mxu0 %v2940_v61  ;;  %2260 = vmatprep.subr.bf16.mxu1 %v2943_v62  ;;  %v2957_v8 = vld [vmem:[%s3990_s1 + $0x608] ss:$16 sps:$4 sm:$0xff]   ;;  %v793_v9 = vld [vmem:[%s3989_s0 + $0x20] sm:$0xff]  ;;  %v2961_v11 = vld [vmem:[%s3990_s1 + $0x62c] ss:$16 sps:$4 sm:$0xff]   ;;  %vm1498_vm0 = vcmask 130048  }
  0xb9   :  { %v2958_v10 = vld [vmem:[%s3990_s1 + $0x624] ss:$16 sps:$4 sm:$0xff]   ;;  %v796_v12 = vld [vmem:[%s3989_s0 + $0x38] sm:$0xff]  ;;  %v2960_v13 = vld [vmem:[%s3990_s1 + $0x620] ss:$16 sps:$4 sm:$0xff]   ;;  %s3073_s19 = smov [#allocation2]  }
  0xba   :  { %v2963_v14 = vld [vmem:[%s3990_s1 + $0x628] ss:$16 sps:$4 sm:$0xff]   ;;  %v2964_v15 = vld [vmem:[%s3990_s1 + $0x644] ss:$16 sps:$4 sm:$0xff]   ;;  %v2967_v16 = vld [vmem:[%s3990_s1 + $0x64c] ss:$16 sps:$4 sm:$0xff]  }
  0xbb   :  { %2006 = vmatpush1.bf16.msra.mxu0 %v2942_v63  ;;  %2262 = vmatpush1.bf16.msra.mxu1 %v2945_v0  ;;  %v2966_v17 = vld [vmem:[%s3990_s1 + $0x640] ss:$16 sps:$4 sm:$0xff]   ;;  %v2969_v18 = vld [vmem:[%s3990_s1 + $0x648] ss:$16 sps:$4 sm:$0xff]   ;;  %v2970_v19 = vld [vmem:[%s3990_s1 + $0x664] ss:$16 sps:$4 sm:$0xff]  }
  0xbc   :  { %2008 = vmatprep.subr.bf16.mxu0 %v2946_v1  ;;  %2264 = vmatprep.subr.bf16.mxu1 %v2949_v2  ;;  %v2973_v20 = vld [vmem:[%s3990_s1 + $0x66c] ss:$16 sps:$4 sm:$0xff]   ;;  %v2972_v21 = vld [vmem:[%s3990_s1 + $0x660] ss:$16 sps:$4 sm:$0xff]   ;;  %v2975_v22 = vld [vmem:[%s3990_s1 + $0x668] ss:$16 sps:$4 sm:$0xff]  }
  0xbd   :  { %v2976_v23 = vld [vmem:[%s3990_s1 + $0x684] ss:$16 sps:$4 sm:$0xff]   ;;  %v2979_v24 = vld [vmem:[%s3990_s1 + $0x68c] ss:$16 sps:$4 sm:$0xff]   ;;  %v2978_v25 = vld [vmem:[%s3990_s1 + $0x680] ss:$16 sps:$4 sm:$0xff]  }
  0xbe   :  { %v2981_v26 = vld [vmem:[%s3990_s1 + $0x688] ss:$16 sps:$4 sm:$0xff]   ;;  %v2982_v27 = vld [vmem:[%s3990_s1 + $0x6a4] ss:$16 sps:$4 sm:$0xff]   ;;  %v2985_v28 = vld [vmem:[%s3990_s1 + $0x6ac] ss:$16 sps:$4 sm:$0xff]  }
  0xbf   :  { %2010 = vmatpush1.bf16.msra.mxu0 %v2948_v3  ;;  %2266 = vmatpush1.bf16.msra.mxu1 %v2951_v4  ;;  %v2984_v29 = vld [vmem:[%s3990_s1 + $0x6a0] ss:$16 sps:$4 sm:$0xff]   ;;  %v2987_v30 = vld [vmem:[%s3990_s1 + $0x6a8] ss:$16 sps:$4 sm:$0xff]   ;;  %v2988_v31 = vld [vmem:[%s3990_s1 + $0x6c4] ss:$16 sps:$4 sm:$0xff]  }
  0xc0   :  { %2012 = vmatprep.subr.bf16.mxu0 %v2952_v5  ;;  %2268 = vmatprep.subr.bf16.mxu1 %v2955_v6  ;;  %v2991_v32 = vld [vmem:[%s3990_s1 + $0x6cc] ss:$16 sps:$4 sm:$0xff]   ;;  %v2990_v33 = vld [vmem:[%s3990_s1 + $0x6c0] ss:$16 sps:$4 sm:$0xff]   ;;  %v2993_v34 = vld [vmem:[%s3990_s1 + $0x6c8] ss:$16 sps:$4 sm:$0xff]  }
  0xc1   :  { %v2994_v35 = vld [vmem:[%s3990_s1 + $0x6e4] ss:$16 sps:$4 sm:$0xff]   ;;  %v2997_v36 = vld [vmem:[%s3990_s1 + $0x6ec] ss:$16 sps:$4 sm:$0xff]   ;;  %v2996_v37 = vld [vmem:[%s3990_s1 + $0x6e0] ss:$16 sps:$4 sm:$0xff]  }
  0xc2   :  { %1026 = vmatmul.mubr.f32.vlgmr.msra.gmra.mrb[0].mxu0 %v793_v9  ;;  %1310 = vmatmul.mubr.f32.vlgmr.msra.gmra.mrb[0].mxu1 %v793_v9  ;;  %v2999_v38 = vld [vmem:[%s3990_s1 + $0x6e8] ss:$16 sps:$4 sm:$0xff]   ;;  %v3000_v39 = vld [vmem:[%s3990_s1 + $0x704] ss:$16 sps:$4 sm:$0xff]   ;;  %v3003_v40 = vld [vmem:[%s3990_s1 + $0x70c] ss:$16 sps:$4 sm:$0xff]  }
  0xc3   :  { %2014 = vmatpush1.bf16.msra.mxu0 %v2954_v7  ;;  %2270 = vmatpush1.bf16.msra.mxu1 %v2957_v8  ;;  %v3002_v41 = vld [vmem:[%s3990_s1 + $0x700] ss:$16 sps:$4 sm:$0xff]   ;;  %v3005_v42 = vld [vmem:[%s3990_s1 + $0x708] ss:$16 sps:$4 sm:$0xff]   ;;  %v3006_v43 = vld [vmem:[%s3990_s1 + $0x724] ss:$16 sps:$4 sm:$0xff]  }
  0xc4   :  { %2016 = vmatprep.subr.bf16.mxu0 %v2958_v10  ;;  %2272 = vmatprep.subr.bf16.mxu1 %v2961_v11  ;;  %v3009_v44 = vld [vmem:[%s3990_s1 + $0x72c] ss:$16 sps:$4 sm:$0xff]   ;;  %v3008_v45 = vld [vmem:[%s3990_s1 + $0x720] ss:$16 sps:$4 sm:$0xff]   ;;  %v3011_v46 = vld [vmem:[%s3990_s1 + $0x728] ss:$16 sps:$4 sm:$0xff]  }
  0xc5   :  { %1096 = vmatprep.mubr.f32.mxu0 %v796_v12  ;;  %1380 = vmatprep.mubr.f32.mxu1 %v796_v12  ;;  %v3012_v47 = vld [vmem:[%s3990_s1 + $0x744] ss:$16 sps:$4 sm:$0xff]   ;;  %v3015_v48 = vld [vmem:[%s3990_s1 + $0x74c] ss:$16 sps:$4 sm:$0xff]   ;;  %v3014_v49 = vld [vmem:[%s3990_s1 + $0x740] ss:$16 sps:$4 sm:$0xff]  }
  0xc6   :  { %v3017_v50 = vld [vmem:[%s3990_s1 + $0x748] ss:$16 sps:$4 sm:$0xff]   ;;  %v3018_v51 = vld [vmem:[%s3990_s1 + $0x764] ss:$16 sps:$4 sm:$0xff]   ;;  %v3021_v52 = vld [vmem:[%s3990_s1 + $0x76c] ss:$16 sps:$4 sm:$0xff]  }
  0xc7   :  { %2018 = vmatpush1.bf16.msra.mxu0 %v2960_v13  ;;  %2274 = vmatpush1.bf16.msra.mxu1 %v2963_v14  ;;  %v3020_v53 = vld [vmem:[%s3990_s1 + $0x760] ss:$16 sps:$4 sm:$0xff]   ;;  %v3023_v54 = vld [vmem:[%s3990_s1 + $0x768] ss:$16 sps:$4 sm:$0xff]   ;;  %v3024_v55 = vld [vmem:[%s3990_s1 + $0x784] ss:$16 sps:$4 sm:$0xff]  }
  0xc8   :  { %2020 = vmatprep.subr.bf16.mxu0 %v2964_v15  ;;  %2276 = vmatprep.subr.bf16.mxu1 %v2967_v16  ;;  %v3027_v56 = vld [vmem:[%s3990_s1 + $0x78c] ss:$16 sps:$4 sm:$0xff]   ;;  %v3026_v57 = vld [vmem:[%s3990_s1 + $0x780] ss:$16 sps:$4 sm:$0xff]   ;;  %v3029_v58 = vld [vmem:[%s3990_s1 + $0x788] ss:$16 sps:$4 sm:$0xff]  }
  0xc9   :  { %v3030_v59 = vld [vmem:[%s3990_s1 + $0x7a4] ss:$16 sps:$4 sm:$0xff]   ;;  %v3033_v60 = vld [vmem:[%s3990_s1 + $0x7ac] ss:$16 sps:$4 sm:$0xff]   ;;  %v3032_v61 = vld [vmem:[%s3990_s1 + $0x7a0] ss:$16 sps:$4 sm:$0xff]  }
  0xca   :  { %v3035_v62 = vld [vmem:[%s3990_s1 + $0x7a8] ss:$16 sps:$4 sm:$0xff]   ;;  %v3036_v63 = vld [vmem:[%s3990_s1 + $0x7c4] ss:$16 sps:$4 sm:$0xff]   ;;  %v3039_v0 = vld [vmem:[%s3990_s1 + $0x7cc] ss:$16 sps:$4 sm:$0xff]  }
  0xcb   :  { %2022 = vmatpush1.bf16.msra.mxu0 %v2966_v17  ;;  %2278 = vmatpush1.bf16.msra.mxu1 %v2969_v18  ;;  %v3038_v1 = vld [vmem:[%s3990_s1 + $0x7c0] ss:$16 sps:$4 sm:$0xff]   ;;  %v3041_v2 = vld [vmem:[%s3990_s1 + $0x7c8] ss:$16 sps:$4 sm:$0xff]   ;;  %v3042_v3 = vld [vmem:[%s3990_s1 + $0x7e4] ss:$16 sps:$4 sm:$0xff]  }
  0xcc   :  { %2024 = vmatprep.subr.bf16.mxu0 %v2970_v19  ;;  %2280 = vmatprep.subr.bf16.mxu1 %v2973_v20  ;;  %v3045_v4 = vld [vmem:[%s3990_s1 + $0x7ec] ss:$16 sps:$4 sm:$0xff]   ;;  %v3044_v5 = vld [vmem:[%s3990_s1 + $0x7e0] ss:$16 sps:$4 sm:$0xff]   ;;  %v3047_v6 = vld [vmem:[%s3990_s1 + $0x7e8] ss:$16 sps:$4 sm:$0xff]  }
  0xcd   :  { %v1767_v7 = vld [vmem:[%s3992_s3 + $0x40] sm:$0xff]   ;;  %v795_v8 = vld [vmem:[%s3989_s0 + $0x30] sm:$0xff]  ;;  %v3072_v9 = vmov 0.0|0.0   ;;  %v1768_v12 = vld [vmem:[%s3992_s3 + $0x48] sm:$0xff]   ;;  %s1650_s20 = sshll.u32 %s3073_s19, 4  ;;  %vm1642_vm1 = vcmask 293888   ;;  %s1651_s20 = int_to_ptr.vmem [resolvable:$true] %s1650_s20 }
  0xce   :  { %v1775_v10 = vld [vmem:[%s3992_s3 + $0x80] sm:$0xff]   ;;  %v1776_v13 = vld [vmem:[%s3992_s3 + $0x88] sm:$0xff]   ;;  %v1769_v15 = vld [vmem:[%s3992_s3 + $0x50] sm:$0xff]   ;;  %s3048_s21 = scalar_lea.vmem %s1651_s20, 128  ;;  %p3053_p1 = scmp.lt.s32.totalorder %s1651_s20, %s1651_s20 }
  0xcf   :  { %2026 = vmatpush1.bf16.msra.mxu0 %v2972_v21  ;;  %2282 = vmatpush1.bf16.msra.mxu1 %v2975_v22  ;;  %v1661_v11 = vld [vmem:[%s3992_s3] sm:$0xff]   ;;  %v1760_v14 = vld [vmem:[%s3992_s3 + $0x8] sm:$0xff]   ;;  %v1777_v16 = vld [vmem:[%s3992_s3 + $0x90] sm:$0xff]   ;;  %p3049_p0 = scmp.ne.s32.totalorder %s1651_s20, %s3048_s21  ;;  %p3054_p2 = scmp.lt.s32.totalorder %s3048_s21, %s3048_s21 }
  0xd0   :  { %2028 = vmatprep.subr.bf16.mxu0 %v2976_v23  ;;  %2284 = vmatprep.subr.bf16.mxu1 %v2979_v24  ;;  %v1761_v17 = vld [vmem:[%s3992_s3 + $0x10] sm:$0xff]   ;;  %v1770_v18 = vld [vmem:[%s3992_s3 + $0x58] sm:$0xff]   ;;  %v1771_v21 = vld [vmem:[%s3992_s3 + $0x60] sm:$0xff]  }
  0xd1   :  { %v1778_v19 = vld [vmem:[%s3992_s3 + $0x98] sm:$0xff]   ;;  %v1779_v22 = vld [vmem:[%s3992_s3 + $0xa0] sm:$0xff]   ;;  %v1772_v24 = vld [vmem:[%s3992_s3 + $0x68] sm:$0xff]   ;;  %p3055_p3 = por %p3054_p2, %p3053_p1 }
  0xd2   :  { %v1762_v20 = vld [vmem:[%s3992_s3 + $0x18] sm:$0xff]   ;;  %v1763_v23 = vld [vmem:[%s3992_s3 + $0x20] sm:$0xff]  }
  0xd3   :  { %2030 = vmatpush1.bf16.msra.mxu0 %v2978_v25  ;;  %2286 = vmatpush1.bf16.msra.mxu1 %v2981_v26  ;;  %v1780_v25 = vld [vmem:[%s3992_s3 + $0xa8] sm:$0xff]   ;;  %p3056_p4 = pnand %p3055_p3, %p3049_p0 }
  0xd4   :  { %2032 = vmatprep.subr.bf16.mxu0 %v2982_v27  ;;  %2288 = vmatprep.subr.bf16.mxu1 %v2985_v28  ;;  %v1764_v26 = vld [vmem:[%s3992_s3 + $0x28] sm:$0xff]   ;;  %v1773_v27 = vld [vmem:[%s3992_s3 + $0x70] sm:$0xff]  }
  0xd5   :  { %v1781_v28 = vld [vmem:[%s3992_s3 + $0xb0] sm:$0xff]  }
  0xd7   :  { %2034 = vmatpush1.bf16.msra.mxu0 %v2984_v29  ;;  %2290 = vmatpush1.bf16.msra.mxu1 %v2987_v30  ;;  %v1765_v29 = vld [vmem:[%s3992_s3 + $0x30] sm:$0xff]   ;;  %v1782_v30 = vld [vmem:[%s3992_s3 + $0xb8] sm:$0xff]  }
  0xd8   :  { %2036 = vmatprep.subr.bf16.mxu0 %v2988_v31  ;;  %2292 = vmatprep.subr.bf16.mxu1 %v2991_v32  ;;  %v1774_v31 = vld [vmem:[%s3992_s3 + $0x78] sm:$0xff]  }
  0xd9   :  { %v1766_v32 = vld [vmem:[%s3992_s3 + $0x38] sm:$0xff]  }
  0xdb   :  { %2038 = vmatpush1.bf16.msra.mxu0 %v2990_v33  ;;  %2294 = vmatpush1.bf16.msra.mxu1 %v2993_v34  ;;  %v1783_v33 = vld [vmem:[%s3992_s3 + $0xc0] sm:$0xff]   ;;  %v799_v34 = vlaneseq }
  0xdc   :  { %2040 = vmatprep.subr.bf16.mxu0 %v2994_v35  ;;  %2296 = vmatprep.subr.bf16.mxu1 %v2997_v36 }
  0xdd   :  { %v800_v35 = vshrl.u32 %v799_v34, 7 }
  0xdf   :  { %2042 = vmatpush1.bf16.msra.mxu0 %v2996_v37  ;;  %2298 = vmatpush1.bf16.msra.mxu1 %v2999_v38  ;;  %v801_v36 = vsub.s32 0, %v800_v35  ;;  %v809_v37 = vsub.s32 2, %v800_v35  ;;  %v797_v38 = vld [vmem:[%s3991_s2] sm:$0xf] }
  0xe0   :  { %2044 = vmatprep.subr.bf16.mxu0 %v3000_v39  ;;  %2300 = vmatprep.subr.bf16.mxu1 %v3003_v40  ;;  %v805_v39 = vsub.s32 1, %v800_v35  ;;  %v813_v40 = vsub.s32 3, %v800_v35 }
  0xe3   :  { %2046 = vmatpush1.bf16.msra.mxu0 %v3002_v41  ;;  %2302 = vmatpush1.bf16.msra.mxu1 %v3005_v42  ;;  %v802_v41 = vrot.slane %v797_v38, %v801_v36  ;;  %v810_v42 = vrot.slane %v797_v38, %v809_v37 }
  0xe4   :  { %2048 = vmatprep.subr.bf16.mxu0 %v3006_v43  ;;  %2304 = vmatprep.subr.bf16.mxu1 %v3009_v44  ;;  %v806_v43 = vrot.slane %v797_v38, %v805_v39  ;;  %v814_v44 = vrot.slane %v797_v38, %v813_v40 }
  0xe7   :  { %2050 = vmatpush1.bf16.msra.mxu0 %v3008_v45  ;;  %2306 = vmatpush1.bf16.msra.mxu1 %v3011_v46 }
  0xe8   :  { %2052 = vmatprep.subr.bf16.mxu0 %v3012_v47  ;;  %2308 = vmatprep.subr.bf16.mxu1 %v3015_v48 }
  0xeb   :  { %2054 = vmatpush1.bf16.msra.mxu0 %v3014_v49  ;;  %2310 = vmatpush1.bf16.msra.mxu1 %v3017_v50 }
  0xec   :  { %2056 = vmatprep.subr.bf16.mxu0 %v3018_v51  ;;  %2312 = vmatprep.subr.bf16.mxu1 %v3021_v52 }
  0xef   :  { %2058 = vmatpush1.bf16.msra.mxu0 %v3020_v53  ;;  %2314 = vmatpush1.bf16.msra.mxu1 %v3023_v54 }
  0xf0   :  { %2060 = vmatprep.subr.bf16.mxu0 %v3024_v55  ;;  %2316 = vmatprep.subr.bf16.mxu1 %v3027_v56 }
  0xf3   :  { %2062 = vmatpush1.bf16.msra.mxu0 %v3026_v57  ;;  %2318 = vmatpush1.bf16.msra.mxu1 %v3029_v58 }
  0xf4   :  { %2064 = vmatprep.subr.bf16.mxu0 %v3030_v59  ;;  %2320 = vmatprep.subr.bf16.mxu1 %v3033_v60  ;;  %v1658_v59 = vld [vmem:[%s3993_s4] ss:$0 sm:$0xff] }
  0xf7   :  { %2066 = vmatpush1.bf16.msra.mxu0 %v3032_v61  ;;  %2322 = vmatpush1.bf16.msra.mxu1 %v3035_v62 }
  0xf8   :  { %2068 = vmatprep.subr.bf16.mxu0 %v3036_v63  ;;  %2324 = vmatprep.subr.bf16.mxu1 %v3039_v0 }
  0xfb   :  { %2070 = vmatpush1.bf16.msra.mxu0 %v3038_v1  ;;  %2326 = vmatpush1.bf16.msra.mxu1 %v3041_v2 }
  0xfc   :  { %2072 = vmatprep.subr.bf16.mxu0 %v3042_v3  ;;  %2328 = vmatprep.subr.bf16.mxu1 %v3045_v4 }
  0xff   :  { %2074 = vmatpush1.bf16.msra.mxu0 %v3044_v5  ;;  %2330 = vmatpush1.bf16.msra.mxu1 %v3047_v6 }
 0x100   :  { %2363 = vmatprep.subr.bf16.mxu1 %v3072_v9  ;;  %2332 = vmatprep.subr.bf16.mxu0 %v1767_v7 }
 0x102   :  { %1097 = vmatmul.mubr.f32.vlgmr.msra.gmra.mrb[0].mxu0 %v795_v8  ;;  %1381 = vmatmul.mubr.f32.vlgmr.msra.gmra.mrb[0].mxu1 %v795_v8 }
 0x103   :  { %2365 = vmatpush1.bf16.msra.mxu1 %v1775_v10  ;;  %2334 = vmatpush3.bf16.msra.mxu0 %v1661_v11 }
 0x104   :  { %2366 = vmatprep.subr.bf16.mxu1 %v3072_v9  ;;  %2336 = vmatprep.subr.bf16.mxu0 %v1768_v12 }
 0x107   :  { %2368 = vmatpush1.bf16.msra.mxu1 %v1776_v13  ;;  %2338 = vmatpush3.bf16.msra.mxu0 %v1760_v14 }
 0x108   :  { %2369 = vmatprep.subr.bf16.mxu1 %v3072_v9  ;;  %2340 = vmatprep.subr.bf16.mxu0 %v1769_v15 }
 0x10b   :  { %2371 = vmatpush1.bf16.msra.mxu1 %v1777_v16  ;;  %2342 = vmatpush3.bf16.msra.mxu0 %v1761_v17 }
 0x10c   :  { %2372 = vmatprep.subr.bf16.mxu1 %v3072_v9  ;;  %2344 = vmatprep.subr.bf16.mxu0 %v1770_v18 }
 0x10f   :  { %2374 = vmatpush1.bf16.msra.mxu1 %v1778_v19  ;;  %2346 = vmatpush3.bf16.msra.mxu0 %v1762_v20 }
 0x110   :  { %2375 = vmatprep.subr.bf16.mxu1 %v3072_v9  ;;  %2348 = vmatprep.subr.bf16.mxu0 %v1771_v21 }
 0x113   :  { %2377 = vmatpush1.bf16.msra.mxu1 %v1779_v22  ;;  %2350 = vmatpush3.bf16.msra.mxu0 %v1763_v23 }
 0x114   :  { %2378 = vmatprep.subr.bf16.mxu1 %v3072_v9  ;;  %2352 = vmatprep.subr.bf16.mxu0 %v1772_v24 }
 0x117   :  { %2380 = vmatpush1.bf16.msra.mxu1 %v1780_v25  ;;  %2354 = vmatpush3.bf16.msra.mxu0 %v1764_v26 }
 0x118   :  { %2381 = vmatprep.subr.bf16.mxu1 %v3072_v9  ;;  %2356 = vmatprep.subr.bf16.mxu0 %v1773_v27 }
 0x11b   :  { %2383 = vmatpush1.bf16.msra.mxu1 %v1781_v28  ;;  %2358 = vmatpush3.bf16.msra.mxu0 %v1765_v29 }
 0x11c   :  { %2384 = vmatprep.subr.bf16.mxu1 %v3072_v9  ;;  %2360 = vmatprep.subr.bf16.mxu0 %v1774_v31 }
 0x11f   :  { %2386 = vmatpush1.bf16.msra.mxu1 %v1782_v30  ;;  %2362 = vmatpush3.bf16.msra.mxu0 %v1766_v32 }
 0x120   :  { %2387 = vmatprep.subr.bf16.mxu1 %v3072_v9 }
 0x123   :  { %2389 = vmatpush1.bf16.msra.mxu1 %v1783_v33 }
 0x1d5   :  { %v1098_v45 = vpop.f32.mrb[0].mxu0  ;;  %v1382_v46 = vpop.f32.mrb[0].mxu1 }
 0x1d6   :  { %v2390_v47 = vadd.f32 %v1098_v45, %v802_v41  ;;  %v2392_v48 = vadd.f32 %v1382_v46, %v810_v42  ;;  %v1100_v49 = vpop.f32.mrb[1].mxu0  ;;  %v1384_v50 = vpop.f32.mrb[1].mxu1 }
 0x1d7   :  { %v2391_v51 = vadd.f32 %v1100_v49, %v806_v43  ;;  %v2393_v52 = vadd.f32 %v1384_v50, %v814_v44 }
 0x1d8   :  { %v1387_v55 = vmax.f32 %v2390_v47, 0.0  ;;  %v1389_v56 = vmax.f32 %v2392_v48, 0.0 }
 0x1d9   :  { %v1388_v53 = vmax.f32 %v2391_v51, 0.0  ;;  %v1390_v54 = vmax.f32 %v2393_v52, 0.0 }
 0x1db   :  { %1566 = vmatprep.mubr.f32.mxu0 %v1388_v53  ;;  %1659 = vmatprep.mubr.msk.f32.mxu1 %vm1498_vm0, %v1390_v54 }
 0x1dc   :  { %1567 = vmatmul.mubr.f32.vlgmr.msra.gmra.mrb[2].mxu0 %v1387_v55  ;;  %1637 = vmatmul.mubr.f32.vlgmr.msra.gmra.mrb[2].mxu1 %v1389_v56 }
 0x2af   :  { %v1816_v57 = vpop.f32.mrb[2].mxu0  ;;  %v1638_v58 = vpop.f32.mrb[2].mxu1 }
 0x2b0   :  { %v1817_v60 = vpop.f32.mrb[3].mxu0  ;;  %v1640_v61 = vpop.f32.mrb[3].mxu1 }
 0x2b1   :  { %v1818_v62 = vadd.f32 %v1817_v60, %v1816_v57 }
 0x2b3   :  { %v1569_v63 = vadd.f32 %v1818_v62, %v1658_v59 }
 0x2b5   :  { %v1639_v0 = vadd.f32 %v1638_v58, %v1569_v63 }
 0x2b7   :  { %1643 = vst.msk [vmem:[#allocation2] sm:$0xff] %vm1642_vm1, %v1639_v0 }
 0x2b8   :  { %3059 = shalt.err (!%p3056_p4)
}
 0x2b9   :  { %s3060_s4 = scalar_lea.hbm %s3994_s5, 128 }
 0x2ba   :  { %p3061_p5 = scmp.ne.s32.totalorder %s3994_s5, %s3060_s4  ;;  %p3064_p6 = scmp.lt.u32.totalorder %s3060_s4, %s3994_s5 }
 0x2bc   :  { %p3066_p7 = pnand %p3064_p6, %p3061_p5 }
 0x2be   :  { %3069 = shalt.err (!%p3066_p7)
}
 0x2bf   :  { %1653 = dma.vmem_to_hbm [thread:$0]  %s1651_s20, 128, %s3994_s5, [#allocation3]  }
 0x2c0   :  { %3070 = dma.done.wait [#allocation3], 128  }
 0x2c1   :  { %3071 = vsyncadd [#allocation3], 4294967168 }
 0x2c2   :  { %1657 = vsyncpa [#allocation3], 1 }

</bundles_post_ra>
